<compile_context>
chip_gen: v6e
topology: v6e:2x2x1
jax: 0.10.0
libtpu: 0.0.40
codegen_flags: <defaults>
</compile_context>

<pallas_src>
import functools

import jax
import jax.numpy as jnp
from jax.experimental import pallas as pl
from jax.experimental.pallas import tpu as pltpu

_IN, _HID, _OUT = 3, 5, 2
_LANES = 128
_GRANULE = 8 * _LANES  # one full f32 vreg of batch rows


def mlp_kernel(w1_ref, b1_ref, w2_ref, b2_ref, x_ref, o_ref):
    """One batch tile.

    x_ref : (3, R, 128)  VMEM  -- R = tb//128 rows of 128 lanes, dense vregs
    o_ref : (2, R, 128)  VMEM  -- dense, unmasked stores
    w1_ref: (3, 5)  SMEM,  b1_ref: (5,) SMEM
    w2_ref: (5, 2)  SMEM,  b2_ref: (2,) SMEM
    """
    xs = [x_ref[k] for k in range(_IN)]                     # 3 x (R, 128), dense

    # Hidden layer: h_j = relu(sum_k x_k * w1[k, j] + b1[j])  (VPU broadcast FMAs)
    h = []
    for j in range(_HID):
        acc = xs[0] * w1_ref[0, j]
        for k in range(1, _IN):
            acc = acc + xs[k] * w1_ref[k, j]
        acc = acc + b1_ref[j]
        h.append(jnp.maximum(acc, 0.0))                     # (R, 128)

    # Output layer: y_i = sum_j h_j * w2[j, i] + b2[i]
    for i in range(_OUT):
        y = h[0] * w2_ref[0, i]
        for j in range(1, _HID):
            y = y + h[j] * w2_ref[j, i]
        y = y + b2_ref[i]
        o_ref[i] = y.astype(o_ref.dtype)                    # dense (R, 128) store


def _round_up(n, m):
    return ((n + m - 1) // m) * m


def _cdiv(a, b):
    return -(-a // b)


@functools.partial(jax.jit, static_argnames=("tb",))
def mlp_forward(x, w1, b1, w2, b2, *, tb=262144):
    """x: (B, 3) f32 -> (B, 2) f32. Matches relu(x @ w1 + b1) @ w2 + b2."""
    B = x.shape[0]

    # Tiles are multiples of 1024 rows (8 sublanes x 128 lanes = one f32 vreg).
    # Split the (padded) batch evenly across tiles so padding waste stays
    # below one granule per tile; large B keeps >= 2 tiles for v7x's two TCs.
    tb_req = max(_GRANULE, _round_up(tb, _GRANULE))
    n_tiles = max(1, _cdiv(B, tb_req))
    tb = _round_up(_cdiv(B, n_tiles), _GRANULE)
    b_pad = n_tiles * tb
    rows = tb // _LANES                                      # rows per block, mult of 8

    # Cheap layout plumbing: pad only if needed, then one transpose + free reshape.
    xf = x.astype(jnp.float32)
    if b_pad != B:
        xf = jnp.pad(xf, ((0, b_pad - B), (0, 0)))
    x_t = xf.T.reshape(_IN, b_pad // _LANES, _LANES)         # (3, b_pad/128, 128)

    smem = pl.BlockSpec(memory_space=pltpu.MemorySpace.SMEM)

    out_t = pl.pallas_call(
        mlp_kernel,
        out_shape=jax.ShapeDtypeStruct((_OUT, b_pad // _LANES, _LANES), jnp.float32),
        grid=(n_tiles,),
        in_specs=[
            smem,                                            # w1 (3, 5)
            smem,                                            # b1 (5,)
            smem,                                            # w2 (5, 2)
            smem,                                            # b2 (2,)
            pl.BlockSpec((_IN, rows, _LANES), lambda i: (0, i, 0)),   # x tile
        ],
        out_specs=pl.BlockSpec((_OUT, rows, _LANES), lambda i: (0, i, 0)),
        compiler_params=pltpu.CompilerParams(
            dimension_semantics=("parallel",),   # shard batch tiles across TCs (v7x)
            vmem_limit_bytes=48 * 1024 * 1024,   # <= v7x 64 MiB; ~10.5 MiB used at tb=256K
        ),
    )(w1, b1, w2, b2, x_t)

    # TODO(synk): keep activations in the packed (3,·,128) layout across the
    # surrounding graph to drop these transpose/slice passes when integrated.
    return out_t.reshape(_OUT, b_pad)[:, :B].T


def init_params(key):
    # Deterministic init mimicking torch.nn.Linear default:
    # U(-1/sqrt(fan_in), 1/sqrt(fan_in)).  Weights stored (in, out) so the
    # forward is x @ W + b (== PyTorch's x @ W.T + b).
    k1, k2, k3, k4 = jax.random.split(key, 4)
    bound1 = 1.0 / jnp.sqrt(3.0)
    bound2 = 1.0 / jnp.sqrt(5.0)
    w1 = jax.random.uniform(k1, (_IN, _HID), jnp.float32, -bound1, bound1)
    b1 = jax.random.uniform(k2, (_HID,), jnp.float32, -bound1, bound1)
    w2 = jax.random.uniform(k3, (_HID, _OUT), jnp.float32, -bound2, bound2)
    b2 = jax.random.uniform(k4, (_OUT,), jnp.float32, -bound2, bound2)
    return w1, b1, w2, b2


if __name__ == "__main__":
    key = jax.random.PRNGKey(0)
    w1, b1, w2, b2 = init_params(key)

    # Small batch; first row mirrors the PyTorch script's x = [1, 2, 3].
    B = 2048
    x = jax.random.normal(jax.random.PRNGKey(1), (B, _IN), jnp.float32)
    x = x.at[0].set(jnp.array([1.0, 2.0, 3.0], jnp.float32))

    # tb=1024 -> grid of 2 batch tiles so the pipelined / parallel path is exercised.
    out = mlp_forward(x, w1, b1, w2, b2, tb=1024)
    out = jax.block_until_ready(out)

    # Pure-JAX reference check.
    ref = jnp.maximum(x @ w1 + b1, 0.0) @ w2 + b2
    assert out.shape == (B, _OUT)
    assert jnp.allclose(out, ref, atol=1e-5, rtol=1e-5)

    # Also check a non-multiple-of-128 batch (padding path) and default tile.
    B2 = 300
    x2 = jax.random.normal(jax.random.PRNGKey(2), (B2, _IN), jnp.float32)
    out2 = jax.block_until_ready(mlp_forward(x2, w1, b1, w2, b2))
    ref2 = jnp.maximum(x2 @ w1 + b1, 0.0) @ w2 + b2
    assert out2.shape == (B2, _OUT)
    assert jnp.allclose(out2, ref2, atol=1e-5, rtol=1e-5)

    print("KERNEL_OK")
</pallas_src>

<mosaic_0001>
module attributes {stable_mosaic.version = 11 : i64} {
  func.func @mlp_kernel(%arg0: i32, %arg1: memref<3x5xf32, #tpu.memory_space<smem>>, %arg2: memref<5xf32, #tpu.memory_space<smem>>, %arg3: memref<5x2xf32, #tpu.memory_space<smem>>, %arg4: memref<2xf32, #tpu.memory_space<smem>>, %arg5: memref<3x8x128xf32, #tpu.memory_space<vmem>>, %arg6: memref<2x8x128xf32, #tpu.memory_space<vmem>>) attributes {dimension_semantics = [#tpu.dimension_semantics<parallel>], iteration_bounds = array<i64: 2>, scalar_prefetch = 0 : i64, scratch_operands = 0 : i64, tpu.core_type = #tpu.core_type<tc>, window_params = [{transform_indices = @transform_0, window_bounds = array<i64: 3, 5>}, {transform_indices = @transform_1, window_bounds = array<i64: 5>}, {transform_indices = @transform_2, window_bounds = array<i64: 5, 2>}, {transform_indices = @transform_3, window_bounds = array<i64: 2>}, {transform_indices = @transform_4, window_bounds = array<i64: 3, 8, 128>}, {transform_indices = @transform_5, window_bounds = array<i64: 2, 8, 128>}]} {
    %c0 = arith.constant 0 : index
    %c0_0 = arith.constant 0 : index
    %c0_1 = arith.constant 0 : index
    %0 = vector.load %arg5[%c0, %c0_0, %c0_1] : memref<3x8x128xf32, #tpu.memory_space<vmem>>, vector<1x8x128xf32>
    %1 = vector.shape_cast %0 : vector<1x8x128xf32> to vector<8x128xf32>
    %c1 = arith.constant 1 : index
    %c0_2 = arith.constant 0 : index
    %c0_3 = arith.constant 0 : index
    %2 = vector.load %arg5[%c1, %c0_2, %c0_3] : memref<3x8x128xf32, #tpu.memory_space<vmem>>, vector<1x8x128xf32>
    %3 = vector.shape_cast %2 : vector<1x8x128xf32> to vector<8x128xf32>
    %c2 = arith.constant 2 : index
    %c0_4 = arith.constant 0 : index
    %c0_5 = arith.constant 0 : index
    %4 = vector.load %arg5[%c2, %c0_4, %c0_5] : memref<3x8x128xf32, #tpu.memory_space<vmem>>, vector<1x8x128xf32>
    %5 = vector.shape_cast %4 : vector<1x8x128xf32> to vector<8x128xf32>
    %c0_6 = arith.constant 0 : index
    %c0_7 = arith.constant 0 : index
    %6 = memref.load %arg1[%c0_6, %c0_7] : memref<3x5xf32, #tpu.memory_space<smem>>
    %7 = vector.broadcast %6 : f32 to vector<8x128xf32>
    %8 = arith.mulf %1, %7 : vector<8x128xf32>
    %c1_8 = arith.constant 1 : index
    %c0_9 = arith.constant 0 : index
    %9 = memref.load %arg1[%c1_8, %c0_9] : memref<3x5xf32, #tpu.memory_space<smem>>
    %10 = vector.broadcast %9 : f32 to vector<8x128xf32>
    %11 = arith.mulf %3, %10 : vector<8x128xf32>
    %12 = arith.addf %8, %11 : vector<8x128xf32>
    %c2_10 = arith.constant 2 : index
    %c0_11 = arith.constant 0 : index
    %13 = memref.load %arg1[%c2_10, %c0_11] : memref<3x5xf32, #tpu.memory_space<smem>>
    %14 = vector.broadcast %13 : f32 to vector<8x128xf32>
    %15 = arith.mulf %5, %14 : vector<8x128xf32>
    %16 = arith.addf %12, %15 : vector<8x128xf32>
    %c0_12 = arith.constant 0 : index
    %17 = memref.load %arg2[%c0_12] : memref<5xf32, #tpu.memory_space<smem>>
    %18 = vector.broadcast %17 : f32 to vector<8x128xf32>
    %19 = arith.addf %16, %18 : vector<8x128xf32>
    %cst = arith.constant 0.000000e+00 : f32
    %20 = vector.broadcast %cst : f32 to vector<8x128xf32>
    %21 = arith.maximumf %19, %20 : vector<8x128xf32>
    %c0_13 = arith.constant 0 : index
    %c1_14 = arith.constant 1 : index
    %22 = memref.load %arg1[%c0_13, %c1_14] : memref<3x5xf32, #tpu.memory_space<smem>>
    %23 = vector.broadcast %22 : f32 to vector<8x128xf32>
    %24 = arith.mulf %1, %23 : vector<8x128xf32>
    %c1_15 = arith.constant 1 : index
    %c1_16 = arith.constant 1 : index
    %25 = memref.load %arg1[%c1_15, %c1_16] : memref<3x5xf32, #tpu.memory_space<smem>>
    %26 = vector.broadcast %25 : f32 to vector<8x128xf32>
    %27 = arith.mulf %3, %26 : vector<8x128xf32>
    %28 = arith.addf %24, %27 : vector<8x128xf32>
    %c2_17 = arith.constant 2 : index
    %c1_18 = arith.constant 1 : index
    %29 = memref.load %arg1[%c2_17, %c1_18] : memref<3x5xf32, #tpu.memory_space<smem>>
    %30 = vector.broadcast %29 : f32 to vector<8x128xf32>
    %31 = arith.mulf %5, %30 : vector<8x128xf32>
    %32 = arith.addf %28, %31 : vector<8x128xf32>
    %c1_19 = arith.constant 1 : index
    %33 = memref.load %arg2[%c1_19] : memref<5xf32, #tpu.memory_space<smem>>
    %34 = vector.broadcast %33 : f32 to vector<8x128xf32>
    %35 = arith.addf %32, %34 : vector<8x128xf32>
    %cst_20 = arith.constant 0.000000e+00 : f32
    %36 = vector.broadcast %cst_20 : f32 to vector<8x128xf32>
    %37 = arith.maximumf %35, %36 : vector<8x128xf32>
    %c0_21 = arith.constant 0 : index
    %c2_22 = arith.constant 2 : index
    %38 = memref.load %arg1[%c0_21, %c2_22] : memref<3x5xf32, #tpu.memory_space<smem>>
    %39 = vector.broadcast %38 : f32 to vector<8x128xf32>
    %40 = arith.mulf %1, %39 : vector<8x128xf32>
    %c1_23 = arith.constant 1 : index
    %c2_24 = arith.constant 2 : index
    %41 = memref.load %arg1[%c1_23, %c2_24] : memref<3x5xf32, #tpu.memory_space<smem>>
    %42 = vector.broadcast %41 : f32 to vector<8x128xf32>
    %43 = arith.mulf %3, %42 : vector<8x128xf32>
    %44 = arith.addf %40, %43 : vector<8x128xf32>
    %c2_25 = arith.constant 2 : index
    %c2_26 = arith.constant 2 : index
    %45 = memref.load %arg1[%c2_25, %c2_26] : memref<3x5xf32, #tpu.memory_space<smem>>
    %46 = vector.broadcast %45 : f32 to vector<8x128xf32>
    %47 = arith.mulf %5, %46 : vector<8x128xf32>
    %48 = arith.addf %44, %47 : vector<8x128xf32>
    %c2_27 = arith.constant 2 : index
    %49 = memref.load %arg2[%c2_27] : memref<5xf32, #tpu.memory_space<smem>>
    %50 = vector.broadcast %49 : f32 to vector<8x128xf32>
    %51 = arith.addf %48, %50 : vector<8x128xf32>
    %cst_28 = arith.constant 0.000000e+00 : f32
    %52 = vector.broadcast %cst_28 : f32 to vector<8x128xf32>
    %53 = arith.maximumf %51, %52 : vector<8x128xf32>
    %c0_29 = arith.constant 0 : index
    %c3 = arith.constant 3 : index
    %54 = memref.load %arg1[%c0_29, %c3] : memref<3x5xf32, #tpu.memory_space<smem>>
    %55 = vector.broadcast %54 : f32 to vector<8x128xf32>
    %56 = arith.mulf %1, %55 : vector<8x128xf32>
    %c1_30 = arith.constant 1 : index
    %c3_31 = arith.constant 3 : index
    %57 = memref.load %arg1[%c1_30, %c3_31] : memref<3x5xf32, #tpu.memory_space<smem>>
    %58 = vector.broadcast %57 : f32 to vector<8x128xf32>
    %59 = arith.mulf %3, %58 : vector<8x128xf32>
    %60 = arith.addf %56, %59 : vector<8x128xf32>
    %c2_32 = arith.constant 2 : index
    %c3_33 = arith.constant 3 : index
    %61 = memref.load %arg1[%c2_32, %c3_33] : memref<3x5xf32, #tpu.memory_space<smem>>
    %62 = vector.broadcast %61 : f32 to vector<8x128xf32>
    %63 = arith.mulf %5, %62 : vector<8x128xf32>
    %64 = arith.addf %60, %63 : vector<8x128xf32>
    %c3_34 = arith.constant 3 : index
    %65 = memref.load %arg2[%c3_34] : memref<5xf32, #tpu.memory_space<smem>>
    %66 = vector.broadcast %65 : f32 to vector<8x128xf32>
    %67 = arith.addf %64, %66 : vector<8x128xf32>
    %cst_35 = arith.constant 0.000000e+00 : f32
    %68 = vector.broadcast %cst_35 : f32 to vector<8x128xf32>
    %69 = arith.maximumf %67, %68 : vector<8x128xf32>
    %c0_36 = arith.constant 0 : index
    %c4 = arith.constant 4 : index
    %70 = memref.load %arg1[%c0_36, %c4] : memref<3x5xf32, #tpu.memory_space<smem>>
    %71 = vector.broadcast %70 : f32 to vector<8x128xf32>
    %72 = arith.mulf %1, %71 : vector<8x128xf32>
    %c1_37 = arith.constant 1 : index
    %c4_38 = arith.constant 4 : index
    %73 = memref.load %arg1[%c1_37, %c4_38] : memref<3x5xf32, #tpu.memory_space<smem>>
    %74 = vector.broadcast %73 : f32 to vector<8x128xf32>
    %75 = arith.mulf %3, %74 : vector<8x128xf32>
    %76 = arith.addf %72, %75 : vector<8x128xf32>
    %c2_39 = arith.constant 2 : index
    %c4_40 = arith.constant 4 : index
    %77 = memref.load %arg1[%c2_39, %c4_40] : memref<3x5xf32, #tpu.memory_space<smem>>
    %78 = vector.broadcast %77 : f32 to vector<8x128xf32>
    %79 = arith.mulf %5, %78 : vector<8x128xf32>
    %80 = arith.addf %76, %79 : vector<8x128xf32>
    %c4_41 = arith.constant 4 : index
    %81 = memref.load %arg2[%c4_41] : memref<5xf32, #tpu.memory_space<smem>>
    %82 = vector.broadcast %81 : f32 to vector<8x128xf32>
    %83 = arith.addf %80, %82 : vector<8x128xf32>
    %cst_42 = arith.constant 0.000000e+00 : f32
    %84 = vector.broadcast %cst_42 : f32 to vector<8x128xf32>
    %85 = arith.maximumf %83, %84 : vector<8x128xf32>
    %c0_43 = arith.constant 0 : index
    %c0_44 = arith.constant 0 : index
    %86 = memref.load %arg3[%c0_43, %c0_44] : memref<5x2xf32, #tpu.memory_space<smem>>
    %87 = vector.broadcast %86 : f32 to vector<8x128xf32>
    %88 = arith.mulf %21, %87 : vector<8x128xf32>
    %c1_45 = arith.constant 1 : index
    %c0_46 = arith.constant 0 : index
    %89 = memref.load %arg3[%c1_45, %c0_46] : memref<5x2xf32, #tpu.memory_space<smem>>
    %90 = vector.broadcast %89 : f32 to vector<8x128xf32>
    %91 = arith.mulf %37, %90 : vector<8x128xf32>
    %92 = arith.addf %88, %91 : vector<8x128xf32>
    %c2_47 = arith.constant 2 : index
    %c0_48 = arith.constant 0 : index
    %93 = memref.load %arg3[%c2_47, %c0_48] : memref<5x2xf32, #tpu.memory_space<smem>>
    %94 = vector.broadcast %93 : f32 to vector<8x128xf32>
    %95 = arith.mulf %53, %94 : vector<8x128xf32>
    %96 = arith.addf %92, %95 : vector<8x128xf32>
    %c3_49 = arith.constant 3 : index
    %c0_50 = arith.constant 0 : index
    %97 = memref.load %arg3[%c3_49, %c0_50] : memref<5x2xf32, #tpu.memory_space<smem>>
    %98 = vector.broadcast %97 : f32 to vector<8x128xf32>
    %99 = arith.mulf %69, %98 : vector<8x128xf32>
    %100 = arith.addf %96, %99 : vector<8x128xf32>
    %c4_51 = arith.constant 4 : index
    %c0_52 = arith.constant 0 : index
    %101 = memref.load %arg3[%c4_51, %c0_52] : memref<5x2xf32, #tpu.memory_space<smem>>
    %102 = vector.broadcast %101 : f32 to vector<8x128xf32>
    %103 = arith.mulf %85, %102 : vector<8x128xf32>
    %104 = arith.addf %100, %103 : vector<8x128xf32>
    %c0_53 = arith.constant 0 : index
    %105 = memref.load %arg4[%c0_53] : memref<2xf32, #tpu.memory_space<smem>>
    %106 = vector.broadcast %105 : f32 to vector<8x128xf32>
    %107 = arith.addf %104, %106 : vector<8x128xf32>
    %c0_54 = arith.constant 0 : index
    %c0_55 = arith.constant 0 : index
    %c0_56 = arith.constant 0 : index
    %108 = vector.load %arg6[%c0_54, %c0_55, %c0_56] : memref<2x8x128xf32, #tpu.memory_space<vmem>>, vector<1x8x128xf32>
    %109 = vector.shape_cast %108 : vector<1x8x128xf32> to vector<8x128xf32>
    %110 = vector.shape_cast %107 : vector<8x128xf32> to vector<1x8x128xf32>
    tpu.vector_store %arg6[%c0_54, %c0_55, %c0_56], %110 {strides = array<i32>} : memref<2x8x128xf32, #tpu.memory_space<vmem>>, vector<1x8x128xf32>,
    %c0_57 = arith.constant 0 : index
    %c1_58 = arith.constant 1 : index
    %111 = memref.load %arg3[%c0_57, %c1_58] : memref<5x2xf32, #tpu.memory_space<smem>>
    %112 = vector.broadcast %111 : f32 to vector<8x128xf32>
    %113 = arith.mulf %21, %112 : vector<8x128xf32>
    %c1_59 = arith.constant 1 : index
    %c1_60 = arith.constant 1 : index
    %114 = memref.load %arg3[%c1_59, %c1_60] : memref<5x2xf32, #tpu.memory_space<smem>>
    %115 = vector.broadcast %114 : f32 to vector<8x128xf32>
    %116 = arith.mulf %37, %115 : vector<8x128xf32>
    %117 = arith.addf %113, %116 : vector<8x128xf32>
    %c2_61 = arith.constant 2 : index
    %c1_62 = arith.constant 1 : index
    %118 = memref.load %arg3[%c2_61, %c1_62] : memref<5x2xf32, #tpu.memory_space<smem>>
    %119 = vector.broadcast %118 : f32 to vector<8x128xf32>
    %120 = arith.mulf %53, %119 : vector<8x128xf32>
    %121 = arith.addf %117, %120 : vector<8x128xf32>
    %c3_63 = arith.constant 3 : index
    %c1_64 = arith.constant 1 : index
    %122 = memref.load %arg3[%c3_63, %c1_64] : memref<5x2xf32, #tpu.memory_space<smem>>
    %123 = vector.broadcast %122 : f32 to vector<8x128xf32>
    %124 = arith.mulf %69, %123 : vector<8x128xf32>
    %125 = arith.addf %121, %124 : vector<8x128xf32>
    %c4_65 = arith.constant 4 : index
    %c1_66 = arith.constant 1 : index
    %126 = memref.load %arg3[%c4_65, %c1_66] : memref<5x2xf32, #tpu.memory_space<smem>>
    %127 = vector.broadcast %126 : f32 to vector<8x128xf32>
    %128 = arith.mulf %85, %127 : vector<8x128xf32>
    %129 = arith.addf %125, %128 : vector<8x128xf32>
    %c1_67 = arith.constant 1 : index
    %130 = memref.load %arg4[%c1_67] : memref<2xf32, #tpu.memory_space<smem>>
    %131 = vector.broadcast %130 : f32 to vector<8x128xf32>
    %132 = arith.addf %129, %131 : vector<8x128xf32>
    %c1_68 = arith.constant 1 : index
    %c0_69 = arith.constant 0 : index
    %c0_70 = arith.constant 0 : index
    %133 = vector.load %arg6[%c1_68, %c0_69, %c0_70] : memref<2x8x128xf32, #tpu.memory_space<vmem>>, vector<1x8x128xf32>
    %134 = vector.shape_cast %133 : vector<1x8x128xf32> to vector<8x128xf32>
    %135 = vector.shape_cast %132 : vector<8x128xf32> to vector<1x8x128xf32>
    tpu.vector_store %arg6[%c1_68, %c0_69, %c0_70], %135 {strides = array<i32>} : memref<2x8x128xf32, #tpu.memory_space<vmem>>, vector<1x8x128xf32>,
    return
  }
  func.func @transform_0(%arg0: i32) -> (i32, i32) {
    %c0_i32 = arith.constant 0 : i32
    %c0_i32_0 = arith.constant 0 : i32
    %c0_i32_1 = arith.constant 0 : i32
    return %c0_i32, %c0_i32_0 : i32, i32
  }
  func.func @transform_1(%arg0: i32) -> i32 {
    %c0_i32 = arith.constant 0 : i32
    %c0_i32_0 = arith.constant 0 : i32
    return %c0_i32 : i32
  }
  func.func @transform_2(%arg0: i32) -> (i32, i32) {
    %c0_i32 = arith.constant 0 : i32
    %c0_i32_0 = arith.constant 0 : i32
    %c0_i32_1 = arith.constant 0 : i32
    return %c0_i32, %c0_i32_0 : i32, i32
  }
  func.func @transform_3(%arg0: i32) -> i32 {
    %c0_i32 = arith.constant 0 : i32
    %c0_i32_0 = arith.constant 0 : i32
    return %c0_i32 : i32
  }
  func.func @transform_4(%arg0: i32) -> (i32, i32, i32) {
    %c0_i32 = arith.constant 0 : i32
    %c0_i32_0 = arith.constant 0 : i32
    %c0_i32_1 = arith.constant 0 : i32
    return %c0_i32, %arg0, %c0_i32_0 : i32, i32, i32
  }
  func.func @transform_5(%arg0: i32) -> (i32, i32, i32) {
    %c0_i32 = arith.constant 0 : i32
    %c0_i32_0 = arith.constant 0 : i32
    %c0_i32_1 = arith.constant 0 : i32
    return %c0_i32, %arg0, %c0_i32_0 : i32, i32, i32
  }
}

</mosaic_0001>

<bundles_post_ra>
// kernel: mlp_forward.1
= control target key start
LH: loop header
LB: loop body
LE: loop exit
PB: predicated region body
PF: predicated region fallthrough
CT: control target
= control target key end

     0   :  { %10 = vsyncpa [#allocation3], 0  ;;  %s1001_s0 = inlined_call_operand.vmem [shape: f32[3,5], index: 0, kind: input, shape index: {}]   ;;  %s1002_s1 = inlined_call_operand.vmem [shape: f32[5], index: 1, kind: input, shape index: {}]   ;;  %s1003_s2 = inlined_call_operand.vmem [shape: f32[5,2], index: 2, kind: input, shape index: {}]   ;;  %s1004_s3 = inlined_call_operand.vmem [shape: f32[2], index: 3, kind: input, shape index: {}]   ;;  %s1005_s4 = inlined_call_operand.vmem [shape: f32[3,16,128], index: 4, kind: input, shape index: {}]   ;;  %s1006_s5 = inlined_call_operand.vmem [shape: f32[2,16,128], index: 5, kind: output, shape index: {}]  }
   0x1   :  { %11 = vsyncpa [#allocation5], 0 }
   0x2   :  { %12 = vsyncpa [#allocation8], 0  ;;  %s831_s18 = smov 0   ;;  %s833_s19 = smov 0  }
   0x3   :  { %s835_s20 = smov 0  }
   0x4 LB: > { %s847_s21 = sadd.s32 4294967295, %s795_s20   ;;  %s850_s22 = sadd.s32 1, %s795_s20   ;;  %s795_s20 = sphi %s835_s20, %s1024_s20   ;;  %s791_s19 = sphi %s833_s19, %s1023_s19   ;;  %s787_s18 = sphi %s831_s18, %s1022_s18  }
   0x5   : > { %s106_s23 = ssub.s32 %s795_s20, %s850_s22  ;;  %s109_s24 = sadd.s32 1, %s791_s19 }
   0x6   : > { %p107_p0 = scmp.eq.s32.totalorder %s106_s23, 0  ;;  %p116_p1 = scmp.ne.s32.totalorder %s791_s19, %s787_s18 }
   0x7   : > { %p117_p2 = scmp.eq.s32.totalorder %s795_s20, 0  ;;  %p146_p3 = scmp.eq.s32.totalorder %s847_s21, 1 }
   0x8   : > { %s860_s25 = scalar_select %p107_p0, %s791_s19, %s109_s24  }
   0x9   : > { %p862_p4 = por %p117_p2, %p116_p1  ;;  %p866_p5 = por %p146_p3, %p116_p1 }
   0xa   : > { %p586_p6 = scmp.ge.s32.totalorder %s795_s20, 1  ;;  %p159_p7 = scmp.lt.s32.totalorder %s795_s20, 3 }
   0xb   : > { %s1009_s26 = scalar_select %p862_p4, 1, 0 }
   0xc   : > { %s1010_s27 = scalar_select %p866_p5, 1, 0 }
   0xd   : > { %p1007_p8 = scmp.eq.s32.totalorder %s847_s21, 0  ;;  %p873_p9 = pnand %p586_p6, %p159_p7 }
   0xe   : > { %s183_s6 = sshll.u32 %s1002_s1, 4  ;;  %s172_s9 = sshll.u32 %s1001_s0, 4  ;;  %s184_s6 = int_to_ptr.vmem [resolvable:$true] %s183_s6  ;;  %s173_s9 = int_to_ptr.vmem [resolvable:$true] %s172_s9 }
   0xf   : > { %s1011_s28 = scalar_select %p873_p9, 1, 0 }
  0x10   : > { %p652_p10 = pneg %p873_p9  ;;  %s194_s13 = sshll.u32 %s1003_s2, 4  ;;  %s894_s13 = int_to_ptr.vmem [resolvable:$true] %s194_s13 }
  0x11   : > { %s205_s16 = sshll.u32 %s1004_s3, 4  ;;  %s701_s17 = scalar_lea.vmem %s184_s6, 16  ;;  %s206_s16 = int_to_ptr.vmem [resolvable:$true] %s205_s16 }
  0x12   : > { %p887_p11 = pnand %p1007_p8, %p652_p10  ;;  %p702_p12 = scmp.ne.s32.totalorder %s184_s6, %s701_s17 }
  0x13   : > { %p709_p2 = scmp.lt.s32.totalorder %s184_s6, %s184_s6  ;;  %p710_p3 = scmp.lt.s32.totalorder %s701_s17, %s701_s17 }
  0x14   : > { %p703_p13 = pneg %p887_p11 }
  0x15   : > { %p711_p6 = por %p710_p3, %p709_p2 }
  0x16   : > { %p704_p0 = pnand %p703_p13, %p702_p12 }
  0x18   : > { %p705_p1 = pneg %p704_p0 }
  0x1a   : > { %p712_p7 = pnand %p711_p6, %p705_p1 }
  0x1c   : > { %715 = shalt.err (!%p712_p7)
}
  0x1d   : > { %s797_s23 = smov [#allocation4]   ;;  %s716_s24 = scalar_lea.vmem %s173_s9, 64 }
  0x1e   : > { %658 = dma.vmem_to_smem (!%p887_p11), %s184_s6, 16, %s797_s23, [#allocation5]  }
  0x1f   : > { %p717_p10 = scmp.ne.s32.totalorder %s173_s9, %s716_s24  ;;  %p724_p9 = scmp.lt.s32.totalorder %s173_s9, %s173_s9 }
  0x20   : > { %p725_p4 = scmp.lt.s32.totalorder %s716_s24, %s716_s24 }
  0x21   : > { %p719_p8 = pnand %p717_p10, %p703_p13 }
  0x22   : > { %p726_p12 = por %p725_p4, %p724_p9 }
  0x23   : > { %p720_p5 = pneg %p719_p8 }
  0x25   : > { %p727_p0 = pnand %p726_p12, %p720_p5 }
  0x27   : > { %730 = shalt.err (!%p727_p0)
}
  0x28   : > { %s798_s29 = smov [#allocation2]   ;;  %s731_s30 = scalar_lea.vmem %s894_s13, 128 }
  0x29   : > { %655 = dma.vmem_to_smem (!%p887_p11), %s173_s9, 64, %s798_s29, [#allocation3]  }
  0x2a   : > { %p732_p1 = scmp.ne.s32.totalorder %s894_s13, %s731_s30  ;;  %p739_p8 = scmp.lt.s32.totalorder %s894_s13, %s894_s13 }
  0x2b   : > { %p740_p6 = scmp.lt.s32.totalorder %s731_s30, %s731_s30 }
  0x2c   : > { %p734_p2 = pnand %p732_p1, %p703_p13 }
  0x2d   : > { %p741_p4 = por %p740_p6, %p739_p8 }
  0x2e   : > { %p735_p3 = pneg %p734_p2 }
  0x30   : > { %p742_p5 = pnand %p741_p4, %p735_p3 }
  0x32   : > { %745 = shalt.err (!%p742_p5)
}
  0x33   : > { %s799_s6 = smov [#allocation6]   ;;  %s746_s9 = scalar_lea.vmem %s206_s16, 16 }
  0x34   : > { %661 = dma.vmem_to_smem (!%p887_p11), %s894_s13, 128, %s799_s6, [#allocation5]  }
  0x35   : > { %p747_p9 = scmp.ne.s32.totalorder %s206_s16, %s746_s9  ;;  %p754_p12 = scmp.lt.s32.totalorder %s206_s16, %s206_s16 }
  0x36   : > { %p755_p0 = scmp.lt.s32.totalorder %s746_s9, %s746_s9 }
  0x37   : > { %p749_p7 = pnand %p747_p9, %p703_p13 }
  0x38   : > { %p756_p1 = por %p755_p0, %p754_p12 }
  0x39   : > { %p750_p10 = pneg %p749_p7 }
  0x3b   : > { %p757_p2 = pnand %p756_p1, %p750_p10 }
  0x3d   : > { %760 = shalt.err (!%p757_p2)
}
  0x3e   : > { %s800_s11 = smov [#allocation7]   ;;  %p591_p3 = scmp.ge.s32.totalorder %s795_s20, 2 }
  0x3f   : > { %664 = dma.vmem_to_smem (!%p887_p11), %s206_s16, 16, %s800_s11, [#allocation8]  }
  0x40   : > { %212 = sbr.rel (%p591_p3) target bundleno = 75 (0x4b), region = 32  ;;  %p1013_p8 = scmp.ne.s32.totalorder (!%p591_p3), %s1009_s26, 0 }
  0x45   : > { %215 = sbr.rel (!%p1013_p8) target bundleno = 75 (0x4b), region = 36  ;;  %s217_s12 = sand.u32 (%p1013_p8), 1, %s791_s19  }
  0x46   : > { %s592_s13 = sshll.u32 (%p1013_p8), %s795_s20, 3  ;;  %s634_s14 = smul.u32 (%p1013_p8), 24, %s217_s12 }
  0x47   : > { %s221_s23 = scalar_lea.vmem (%p1013_p8), %s1005_s4, %s592_s13 }
  0x48   : > { %v254_v0 = vld [vmem:[%s221_s23] sm:$0xff] (%p1013_p8)  ;;  %v256_v1 = vld [vmem:[%s221_s23 + $0x10] sm:$0xff] (%p1013_p8)  ;;  %s219_s10 = scalar_lea.vmem (%p1013_p8), [#allocation9], %s634_s14 }
  0x49   : > { %v258_v2 = vld [vmem:[%s221_s23 + $0x20] sm:$0xff] (%p1013_p8)  ;;  %255 = vst [vmem:[%s219_s10] sm:$0xff] (%p1013_p8), %v254_v0  ;;  %257 = vst [vmem:[%s219_s10 + $0x8] sm:$0xff] (%p1013_p8), %v256_v1 }
  0x4a   : > { %259 = vst [vmem:[%s219_s10 + $0x10] sm:$0xff] %v258_v2 }
  0x4b PF: > { %p1014_p11 = scmp.ne.s32.totalorder %s1011_s28, 0 }
  0x4c   : > { %p1015_p13 = scmp.eq.s32.totalorder (!%p1014_p11), %s847_s21, 0 }
  0x4d   : > { %268 = sbr.rel (%p1014_p11) target bundleno = 150 (0x96), region = 74 }
  0x52   : > { %774 = dma.done.wait (%p1015_p13), [#allocation3], 64   ;;  %p1016_p6 = pmov %p1015_p13 }
  0x54   : > { %776 = vsyncadd (%p1016_p6), [#allocation3], 4294967232  ;;  %p1017_p4 = pmov %p1016_p6 }
  0x56   : > { %778 = dma.done.wait (%p1017_p4), [#allocation5], 144   ;;  %p1018_p5 = pmov %p1017_p4 }
  0x57   : > { %p1019_p9 = pmov %p1017_p4 }
  0x58   : > { %780 = vsyncadd (%p1018_p5), [#allocation5], 4294967152 }
  0x59   : > { %782 = dma.done.wait (%p1019_p9), [#allocation8], 16   ;;  %p1020_p7 = pmov %p1017_p4 }
  0x5a   : > { %s287_s20 = sand.u32 1, %s787_s18  }
  0x5b   : > { %784 = vsyncadd (%p1020_p7), [#allocation8], 4294967280  ;;  %s635_s26 = smul.u32 24, %s287_s20 }
  0x5d   : > { %s289_s28 = scalar_lea.vmem [#allocation9], %s635_s26 }
  0x5e   : > { %293 = sfence }
  0x5f   : > { %s319_s16 = sld [smem:[#allocation2]]  ;;  %v314_v3 = vld [vmem:[%s289_s28] sm:$0xff]  ;;  %v957_v4 = vld [vmem:[%s289_s28 + $0x8] sm:$0xff]  ;;  %v600_v8 = vld [vmem:[%s289_s28 + $0x10] sm:$0xff]  ;;  %p1021_p10 = scmp.ne.s32.totalorder %s1010_s27, 0 }
  0x60   : > { %s601_s24 = sld [smem:[#allocation2 + $0x80]]  ;;  %s631_s18 = sshll.u32 (%p1021_p10), %s847_s21, 3 }
  0x61   : > { %s602_s29 = sld [smem:[#allocation2 + $0x100]] }
  0x62   : > { %s955_s30 = sld [smem:[#allocation4]] }
  0x63   : > { %s603_s6 = sld [smem:[#allocation2 + $0x1]] }
  0x64   : > { %s604_s7 = sld [smem:[#allocation2 + $0x81]] }
  0x65   : > { %v320_v5 = vstv %s319_s16  ;;  %s605_s8 = sld [smem:[#allocation2 + $0x101]] }
  0x66   : > { %v321_v6 = vmul.f32 %v320_v5, %v314_v3  ;;  %v323_v7 = vstv %s601_s24  ;;  %s959_s9 = sld [smem:[#allocation4 + $0x1]] }
  0x67   : > { %v324_v9 = vmul.f32 %v957_v4, %v323_v7  ;;  %v327_v10 = vstv %s602_s29  ;;  %s607_s11 = sld [smem:[#allocation2 + $0x2]] }
  0x68   : > { %s608_s12 = sld [smem:[#allocation2 + $0x82]]  ;;  %v328_v13 = vmul.f32 %v600_v8, %v327_v10  ;;  %v331_v24 = vstv %s955_s30 }
  0x69   : > { %v335_v11 = vstv %s603_s6  ;;  %s609_s13 = sld [smem:[#allocation2 + $0x102]]  ;;  %v325_v12 = vadd.f32 %v324_v9, %v321_v6 }
  0x6a   : > { %v336_v14 = vmul.f32 %v335_v11, %v314_v3  ;;  %v338_v15 = vstv %s604_s7  ;;  %s962_s14 = sld [smem:[#allocation4 + $0x2]] }
  0x6b   : > { %v339_v16 = vmul.f32 %v957_v4, %v338_v15  ;;  %v342_v17 = vstv %s605_s8  ;;  %s611_s15 = sld [smem:[#allocation2 + $0x3]]  ;;  %v329_v21 = vadd.f32 %v328_v13, %v325_v12 }
  0x6c   : > { %v343_v18 = vmul.f32 %v600_v8, %v342_v17  ;;  %s612_s17 = sld [smem:[#allocation2 + $0x83]]  ;;  %v346_v28 = vstv %s959_s9 }
  0x6d   : > { %v340_v19 = vadd.f32 %v339_v16, %v336_v14  ;;  %v350_v20 = vstv %s607_s11  ;;  %s613_s23 = sld [smem:[#allocation2 + $0x103]]  ;;  %v332_v32 = vadd.f32 %v331_v24, %v329_v21 }
  0x6e   : > { %v351_v22 = vmul.f32 %v350_v20, %v314_v3  ;;  %v353_v23 = vstv %s608_s12  ;;  %s965_s10 = sld [smem:[#allocation4 + $0x3]] }
  0x6f   : > { %v344_v25 = vadd.f32 %v343_v18, %v340_v19  ;;  %v354_v26 = vmul.f32 %v957_v4, %v353_v23  ;;  %v357_v27 = vstv %s609_s13  ;;  %s615_s26 = sld [smem:[#allocation2 + $0x4]]  ;;  %v333_v44 = vmax.f32 %v332_v32, 0.0 }
  0x70   : > { %v358_v29 = vmul.f32 %v600_v8, %v357_v27  ;;  %s616_s28 = sld [smem:[#allocation2 + $0x84]]  ;;  %v361_v33 = vstv %s962_s14 }
  0x71   : > { %v355_v30 = vadd.f32 %v354_v26, %v351_v22  ;;  %v365_v31 = vstv %s611_s15  ;;  %s617_s16 = sld [smem:[#allocation2 + $0x104]]  ;;  %v347_v36 = vadd.f32 %v346_v28, %v344_v25 }
  0x72   : > { %v366_v34 = vmul.f32 %v365_v31, %v314_v3  ;;  %v368_v35 = vstv %s612_s17  ;;  %s971_s24 = sld [smem:[#allocation4 + $0x4]] }
  0x73   : > { %v359_v37 = vadd.f32 %v358_v29, %v355_v30  ;;  %v369_v38 = vmul.f32 %v957_v4, %v368_v35  ;;  %v372_v39 = vstv %s613_s23  ;;  %s394_s29 = sld [smem:[#allocation6]]  ;;  %v348_v48 = vmax.f32 %v347_v36, 0.0  ;;  %s598_s23 = sshll.u32 %s287_s20, 4 }
  0x74   : > { %v373_v40 = vmul.f32 %v600_v8, %v372_v39  ;;  %s619_s30 = sld [smem:[#allocation6 + $0x80]]  ;;  %v376_v45 = vstv %s965_s10  ;;  %s313_s10 = scalar_lea.vmem [#allocation10], %s598_s23 }
  0x75   : > { %v362_v41 = vadd.f32 %v361_v33, %v359_v37  ;;  %v370_v42 = vadd.f32 %v369_v38, %v366_v34  ;;  %v380_v43 = vstv %s615_s26  ;;  %s620_s6 = sld [smem:[#allocation6 + $0x100]] }
  0x76   : > { %v381_v46 = vmul.f32 %v380_v43, %v314_v3  ;;  %v383_v47 = vstv %s616_s28  ;;  %s621_s7 = sld [smem:[#allocation6 + $0x180]]  ;;  %s449_s28 = scalar_lea.vmem (%p1021_p10), %s1006_s5, %s631_s18 }
  0x77   : > { %v374_v49 = vadd.f32 %v373_v40, %v370_v42  ;;  %v384_v50 = vmul.f32 %v957_v4, %v383_v47  ;;  %v387_v51 = vstv %s617_s16  ;;  %s976_s8 = sld [smem:[#allocation6 + $0x200]]  ;;  %v363_v52 = vmax.f32 %v362_v41, 0.0 }
  0x78   : > { %v388_v53 = vmul.f32 %v600_v8, %v387_v51  ;;  %s978_s9 = sld [smem:[#allocation7]]  ;;  %v391_v57 = vstv %s971_s24 }
  0x79   : > { %v377_v54 = vadd.f32 %v376_v45, %v374_v49  ;;  %v385_v55 = vadd.f32 %v384_v50, %v381_v46  ;;  %v395_v56 = vstv %s394_s29  ;;  %s623_s11 = sld [smem:[#allocation6 + $0x1]] }
  0x7a   : > { %v396_v58 = vmul.f32 %v395_v56, %v333_v44  ;;  %v398_v59 = vstv %s619_s30  ;;  %s624_s12 = sld [smem:[#allocation6 + $0x81]] }
  0x7b   : > { %v378_v60 = vmax.f32 %v377_v54, 0.0  ;;  %v389_v61 = vadd.f32 %v388_v53, %v385_v55  ;;  %v399_v62 = vmul.f32 %v398_v59, %v348_v48  ;;  %v402_v63 = vstv %s620_s6  ;;  %s625_s13 = sld [smem:[#allocation6 + $0x101]] }
  0x7c   : > { %v403_v0 = vmul.f32 %v402_v63, %v363_v52  ;;  %v406_v1 = vstv %s621_s7  ;;  %s626_s14 = sld [smem:[#allocation6 + $0x181]] }
  0x7d   : > { %v392_v2 = vadd.f32 %v391_v57, %v389_v61  ;;  %v400_v3 = vadd.f32 %v399_v62, %v396_v58  ;;  %v407_v4 = vmul.f32 %v406_v1, %v378_v60  ;;  %s627_s15 = sld [smem:[#allocation6 + $0x201]]  ;;  %v410_v5 = vstv %s976_s8 }
  0x7e   : > { %s628_s17 = sld [smem:[#allocation7 + $0x1]]  ;;  %v414_v15 = vstv %s978_s9 }
  0x7f   : > { %v393_v6 = vmax.f32 %v392_v2, 0.0  ;;  %v404_v7 = vadd.f32 %v403_v0, %v400_v3  ;;  %v418_v8 = vstv %s623_s11 }
  0x80   : > { %v419_v9 = vmul.f32 %v418_v8, %v333_v44  ;;  %v421_v10 = vstv %s624_s12 }
  0x81   : > { %v408_v11 = vadd.f32 %v407_v4, %v404_v7  ;;  %v411_v12 = vmul.f32 %v410_v5, %v393_v6  ;;  %v422_v13 = vmul.f32 %v421_v10, %v348_v48  ;;  %v425_v14 = vstv %s625_s13 }
  0x82   : > { %v426_v16 = vmul.f32 %v425_v14, %v363_v52  ;;  %v429_v17 = vstv %s626_s14 }
  0x83   : > { %v412_v18 = vadd.f32 %v411_v12, %v408_v11  ;;  %v423_v19 = vadd.f32 %v422_v13, %v419_v9  ;;  %v430_v20 = vmul.f32 %v429_v17, %v378_v60  ;;  %v433_v21 = vstv %s627_s15 }
  0x84   : > { %v434_v24 = vmul.f32 %v433_v21, %v393_v6  ;;  %v437_v26 = vstv %s628_s17 }
  0x85   : > { %v415_v22 = vadd.f32 %v414_v15, %v412_v18  ;;  %v427_v23 = vadd.f32 %v426_v16, %v423_v19 }
  0x87   : > { %416 = vst [vmem:[%s313_s10] sm:$0xff] %v415_v22  ;;  %v431_v25 = vadd.f32 %v430_v20, %v427_v23 }
  0x89   : > { %v435_v27 = vadd.f32 %v434_v24, %v431_v25  ;;  %447 = sbr.rel (!%p1021_p10) target bundleno = 150 (0x96), region = 98 }
  0x8b   : > { %v438_v28 = vadd.f32 %v437_v26, %v435_v27 }
  0x8d   : > { %629 = vst [vmem:[%s313_s10 + $0x8] sm:$0xff] %v438_v28 }
  0x8e   : > { %v480_v29 = vld [vmem:[%s313_s10] sm:$0xff] }
  0x8f   : > { %481 = vst [vmem:[%s449_s28] sm:$0xff] %v480_v29 }
  0x94   : > { %v482_v30 = vld [vmem:[%s313_s10 + $0x8] sm:$0xff] }
  0x95   : > { %483 = vst [vmem:[%s449_s28 + $0x10] sm:$0xff] %v482_v30 }
  0x96 PF: > { %p15_p12 = scmp.ge.s32.totalorder %s850_s22, 4   ;;  %s1022_s18 = smov %s791_s19 }
  0x97   : > { %s1023_s19 = smov %s860_s25  ;;  %s1024_s20 = smov %s850_s22 }
  0x98   :  { %17 = sbr.rel (!%p15_p12) target bundleno = 4 (0x4), region = 171 }
  0x9d   :  { %499 = vsyncpa [#allocation3], 1 }
  0x9e   :  { %501 = vsyncpa [#allocation3 + $0x1], 1 }
  0x9f   :  { %502 = vsyncpa [#allocation5], 1 }
  0xa0   :  { %503 = vsyncpa [#allocation8], 1 }

</bundles_post_ra>
